<compile_context>
chip_gen: v5e
topology: v5e:2x2
jax: 0.10.0
libtpu: 0.0.40
codegen_flags: <defaults>
</compile_context>

<pallas_src>
import functools

import jax
import jax.numpy as jnp
from jax import lax
from jax.experimental import pallas as pl
from jax.experimental.pallas import tpu as pltpu


def _round_up(n, m):
    return -(-n // m) * m


def _mlp_kernel(x_ref, w1_ref, aff_ref, w2_ref, bits_ref, o_ref,
                *, p, eps, h_pad, o_pad):
    # Packed per-feature vectors: row0=b1, row1=gamma, row2=beta, row3=b2.
    b1 = aff_ref[0:1, :h_pad]
    gamma = aff_ref[1:2, :h_pad]
    beta = aff_ref[2:3, :h_pad]
    b2 = aff_ref[3:4, :o_pad]

    # Dropout keep-mask first: cheap VPU compare that can overlap the MXU work.
    if p > 0.0:
        thr = jnp.uint32(min(int(round(p * 4294967296.0)), 0xFFFFFFFF))
        keep = bits_ref[...] >= thr              # drop with probability p
        inv_keep = jnp.float32(1.0 / (1.0 - p))

    # ---- layer_1 + ReLU: bf16 MXU operands, f32 accumulation ----
    h = jnp.dot(x_ref[...].astype(jnp.bfloat16),
                w1_ref[...].astype(jnp.bfloat16),
                preferred_element_type=jnp.float32)
    h = jnp.maximum(h + b1, 0.0)                 # (B, H) f32

    # ---- BatchNorm1d, training-mode (biased batch stats), folded affine ----
    mean = jnp.mean(h, axis=0, keepdims=True)                    # (1, H)
    var = jnp.maximum(jnp.mean(h * h, axis=0, keepdims=True) - mean * mean, 0.0)
    scale = gamma * lax.rsqrt(var + eps)                         # EUP rsqrt
    shift = beta - mean * scale
    h = h * scale + shift

    # ---- Dropout(p), training mode ----
    if p > 0.0:
        h = jnp.where(keep, h * inv_keep, 0.0)

    # ---- layer_out: bf16 MXU operands, f32 accumulation ----
    out = jnp.dot(h.astype(jnp.bfloat16),
                  w2_ref[...].astype(jnp.bfloat16),
                  preferred_element_type=jnp.float32)
    o_ref[...] = (out + b2).astype(o_ref.dtype)


def network_forward(x, params, *, key, p=0.2, eps=1e-5):
    """Full forward pass inside one Pallas kernel (lane-dense padded)."""
    w1, b1, gamma, beta, w2, b2 = params
    B, d_in = x.shape
    H = w1.shape[1]
    d_out = w2.shape[1]

    LANE = 128
    d_in_p = _round_up(d_in, LANE)
    h_pad = _round_up(H, LANE)
    o_pad = _round_up(d_out, LANE)
    W = max(h_pad, o_pad)

    # Zero-pad everything to lane-dense shapes (padding rows/cols contribute 0).
    x_p = jnp.pad(x.astype(jnp.float32), ((0, 0), (0, d_in_p - d_in)))
    w1_p = jnp.pad(w1, ((0, d_in_p - d_in), (0, h_pad - H)))
    w2_p = jnp.pad(w2, ((0, h_pad - H), (0, o_pad - d_out)))

    # Pack the four small per-feature vectors into one (8, 128) VMEM tile.
    aff = jnp.zeros((8, W), jnp.float32)
    aff = aff.at[0, :H].set(b1.reshape(-1))
    aff = aff.at[1, :H].set(gamma.reshape(-1))
    aff = aff.at[2, :H].set(beta.reshape(-1))
    aff = aff.at[3, :d_out].set(b2.reshape(-1))

    # Dropout randomness: caller should fold a step counter into `key` so the
    # mask changes every training step.
    if p > 0.0:
        bits = jax.random.bits(key, (B, h_pad), dtype=jnp.uint32)
    else:
        bits = jnp.zeros((B, h_pad), jnp.uint32)

    vmem = pl.BlockSpec(memory_space=pltpu.MemorySpace.VMEM)
    out_p = pl.pallas_call(
        functools.partial(_mlp_kernel, p=p, eps=eps, h_pad=h_pad, o_pad=o_pad),
        out_shape=jax.ShapeDtypeStruct((B, o_pad), jnp.float32),
        in_specs=[vmem, vmem, vmem, vmem, vmem],
        out_specs=vmem,
    )(x_p, w1_p, aff, w2_p, bits)
    return out_p[:, :d_out]


def init_params(key, input_size, hidden1_size, output_size):
    """Deterministic init mimicking torch.nn.Linear defaults (U[-1/sqrt(fan_in), +])."""
    k1, k2, k3, k4 = jax.random.split(key, 4)
    lim1 = 1.0 / jnp.sqrt(input_size)
    lim2 = 1.0 / jnp.sqrt(hidden1_size)
    w1 = jax.random.uniform(k1, (input_size, hidden1_size), jnp.float32, -lim1, lim1)
    b1 = jax.random.uniform(k2, (1, hidden1_size), jnp.float32, -lim1, lim1)
    w2 = jax.random.uniform(k3, (hidden1_size, output_size), jnp.float32, -lim2, lim2)
    b2 = jax.random.uniform(k4, (1, output_size), jnp.float32, -lim2, lim2)
    gamma = jnp.ones((1, hidden1_size), jnp.float32)   # BatchNorm1d.weight
    beta = jnp.zeros((1, hidden1_size), jnp.float32)   # BatchNorm1d.bias
    return (w1, b1, gamma, beta, w2, b2)


def _reference_no_dropout(x, params, eps=1e-5):
    """Pure-JAX reference (dropout disabled) mirroring the kernel's bf16/BN math."""
    w1, b1, gamma, beta, w2, b2 = params
    h = jnp.dot(x.astype(jnp.bfloat16), w1.astype(jnp.bfloat16),
                preferred_element_type=jnp.float32)
    h = jnp.maximum(h + b1, 0.0)
    mean = jnp.mean(h, axis=0, keepdims=True)
    var = jnp.maximum(jnp.mean(h * h, axis=0, keepdims=True) - mean * mean, 0.0)
    scale = gamma * lax.rsqrt(var + eps)
    h = h * scale + (beta - mean * scale)
    return jnp.dot(h.astype(jnp.bfloat16), w2.astype(jnp.bfloat16),
                   preferred_element_type=jnp.float32) + b2


if __name__ == "__main__":
    input_size, hidden1_size, output_size = 32, 32, 4
    batch = 8   # multiple of 8 keeps the sublane dim aligned

    key = jax.random.PRNGKey(0)
    kx, kp, kd = jax.random.split(key, 3)
    x = jax.random.normal(kx, (batch, input_size), jnp.float32)
    params = init_params(kp, input_size, hidden1_size, output_size)

    # Sanity check: kernel with dropout disabled matches pure-JAX reference.
    out_nodrop = network_forward(x, params, key=kd, p=0.0)
    jax.block_until_ready(out_nodrop)
    ref = _reference_no_dropout(x, params)
    assert out_nodrop.shape == (batch, output_size)
    assert jnp.allclose(out_nodrop, ref, atol=1e-2, rtol=1e-2), "mismatch vs reference"

    # Full training-mode forward (batch-stat BN + dropout p=0.2).
    out = network_forward(x, params, key=kd, p=0.2)
    jax.block_until_ready(out)
    assert out.shape == (batch, output_size)
    assert bool(jnp.all(jnp.isfinite(out)))

    print("KERNEL_OK")
</pallas_src>

<mosaic_0001>
module attributes {stable_mosaic.version = 11 : i64} {
  func.func @_mlp_kernel(%arg0: memref<8x128xf32, #tpu.memory_space<vmem>>, %arg1: memref<128x128xf32, #tpu.memory_space<vmem>>, %arg2: memref<8x128xf32, #tpu.memory_space<vmem>>, %arg3: memref<128x128xf32, #tpu.memory_space<vmem>>, %arg4: memref<8x128xi32, #tpu.memory_space<vmem>>, %arg5: memref<8x128xf32, #tpu.memory_space<vmem>>) attributes {dimension_semantics = [], scalar_prefetch = 0 : i64, scratch_operands = 0 : i64, tpu.core_type = #tpu.core_type<tc>} {
    %c0 = arith.constant 0 : index
    %c0_0 = arith.constant 0 : index
    %0 = vector.load %arg2[%c0, %c0_0] : memref<8x128xf32, #tpu.memory_space<vmem>>, vector<1x128xf32>
    %c1 = arith.constant 1 : index
    %c0_1 = arith.constant 0 : index
    %1 = vector.load %arg2[%c1, %c0_1] : memref<8x128xf32, #tpu.memory_space<vmem>>, vector<1x128xf32>
    %c2 = arith.constant 2 : index
    %c0_2 = arith.constant 0 : index
    %2 = vector.load %arg2[%c2, %c0_2] : memref<8x128xf32, #tpu.memory_space<vmem>>, vector<1x128xf32>
    %c3 = arith.constant 3 : index
    %c0_3 = arith.constant 0 : index
    %3 = vector.load %arg2[%c3, %c0_3] : memref<8x128xf32, #tpu.memory_space<vmem>>, vector<1x128xf32>
    %c0_4 = arith.constant 0 : index
    %c0_5 = arith.constant 0 : index
    %4 = vector.load %arg0[%c0_4, %c0_5] : memref<8x128xf32, #tpu.memory_space<vmem>>, vector<8x128xf32>
    %5 = arith.truncf %4 : vector<8x128xf32> to vector<8x128xbf16>
    %c0_6 = arith.constant 0 : index
    %c0_7 = arith.constant 0 : index
    %6 = vector.load %arg1[%c0_6, %c0_7] : memref<128x128xf32, #tpu.memory_space<vmem>>, vector<128x128xf32>
    %7 = arith.truncf %6 : vector<128x128xf32> to vector<128x128xbf16>
    %cst = arith.constant dense<0.000000e+00> : vector<8x128xf32>
    %8 = tpu.matmul %5, %7, %cst {dimension_numbers = #tpu.dot_dimension_numbers<[1], [0], [0], [1], [0, 0, 1, 1], [], []>} : vector<8x128xbf16>, vector<128x128xbf16>, vector<8x128xf32> -> vector<8x128xf32>
    %9 = vector.broadcast %0 : vector<1x128xf32> to vector<8x128xf32>
    %10 = arith.addf %8, %9 : vector<8x128xf32>
    %cst_8 = arith.constant 0.000000e+00 : f32
    %11 = vector.broadcast %cst_8 : f32 to vector<8x128xf32>
    %12 = arith.maximumf %10, %11 : vector<8x128xf32>
    %cst_9 = arith.constant dense<0.000000e+00> : vector<128xf32>
    %13 = vector.multi_reduction <add>, %12, %cst_9 [0] : vector<8x128xf32> to vector<128xf32>
    %14 = vector.shape_cast %13 : vector<128xf32> to vector<1x128xf32>
    %cst_10 = arith.constant 8.000000e+00 : f32
    %15 = vector.broadcast %cst_10 : f32 to vector<1x128xf32>
    %16 = arith.divf %14, %15 : vector<1x128xf32>
    %17 = arith.mulf %12, %12 : vector<8x128xf32>
    %cst_11 = arith.constant dense<0.000000e+00> : vector<128xf32>
    %18 = vector.multi_reduction <add>, %17, %cst_11 [0] : vector<8x128xf32> to vector<128xf32>
    %19 = vector.shape_cast %18 : vector<128xf32> to vector<1x128xf32>
    %cst_12 = arith.constant 8.000000e+00 : f32
    %20 = vector.broadcast %cst_12 : f32 to vector<1x128xf32>
    %21 = arith.divf %19, %20 : vector<1x128xf32>
    %22 = arith.mulf %16, %16 : vector<1x128xf32>
    %23 = arith.subf %21, %22 : vector<1x128xf32>
    %cst_13 = arith.constant 0.000000e+00 : f32
    %24 = vector.broadcast %cst_13 : f32 to vector<1x128xf32>
    %25 = arith.maximumf %23, %24 : vector<1x128xf32>
    %cst_14 = arith.constant 9.99999974E-6 : f32
    %26 = vector.broadcast %cst_14 : f32 to vector<1x128xf32>
    %27 = arith.addf %25, %26 : vector<1x128xf32>
    %28 = math.rsqrt %27 : vector<1x128xf32>
    %29 = arith.mulf %1, %28 : vector<1x128xf32>
    %30 = arith.mulf %16, %29 : vector<1x128xf32>
    %31 = arith.subf %2, %30 : vector<1x128xf32>
    %32 = vector.broadcast %29 : vector<1x128xf32> to vector<8x128xf32>
    %33 = arith.mulf %12, %32 : vector<8x128xf32>
    %34 = vector.broadcast %31 : vector<1x128xf32> to vector<8x128xf32>
    %35 = arith.addf %33, %34 : vector<8x128xf32>
    %36 = arith.truncf %35 : vector<8x128xf32> to vector<8x128xbf16>
    %c0_15 = arith.constant 0 : index
    %c0_16 = arith.constant 0 : index
    %37 = vector.load %arg3[%c0_15, %c0_16] : memref<128x128xf32, #tpu.memory_space<vmem>>, vector<128x128xf32>
    %38 = arith.truncf %37 : vector<128x128xf32> to vector<128x128xbf16>
    %cst_17 = arith.constant dense<0.000000e+00> : vector<8x128xf32>
    %39 = tpu.matmul %36, %38, %cst_17 {dimension_numbers = #tpu.dot_dimension_numbers<[1], [0], [0], [1], [0, 0, 1, 1], [], []>} : vector<8x128xbf16>, vector<128x128xbf16>, vector<8x128xf32> -> vector<8x128xf32>
    %40 = vector.broadcast %3 : vector<1x128xf32> to vector<8x128xf32>
    %41 = arith.addf %39, %40 : vector<8x128xf32>
    %c0_18 = arith.constant 0 : index
    %c0_19 = arith.constant 0 : index
    %42 = vector.load %arg5[%c0_18, %c0_19] : memref<8x128xf32, #tpu.memory_space<vmem>>, vector<8x128xf32>
    tpu.vector_store %arg5[%c0_18, %c0_19], %41 {strides = array<i32>} : memref<8x128xf32, #tpu.memory_space<vmem>>, vector<8x128xf32>,
    return
  }
}

</mosaic_0001>

<bundles_post_ra>
// kernel: tpu_custom_call.1
= control target key start
LH: loop header
LB: loop body
LE: loop exit
PB: predicated region body
PF: predicated region fallthrough
CT: control target
= control target key end

     0   :  { %10 = vsyncpa [#allocation3], 0  ;;  %s464_s0 = inlined_call_operand.hbm [shape: f32[8,128], index: 0, kind: input, shape index: {}]   ;;  %s465_s1 = inlined_call_operand.hbm [shape: f32[128,128], index: 1, kind: input, shape index: {}]   ;;  %s466_s2 = inlined_call_operand.hbm [shape: f32[8,128], index: 2, kind: input, shape index: {}]   ;;  %s467_s3 = inlined_call_operand.hbm [shape: f32[128,128], index: 3, kind: input, shape index: {}]   ;;  %s468_s4 = inlined_call_operand.hbm [shape: u32[8,128], index: 4, kind: input, shape index: {}]   ;;  %s469_s5 = inlined_call_operand.hbm [shape: f32[8,128], index: 5, kind: output, shape index: {}]  }
   0x1   :  { %11 = vsyncpa [#allocation6], 0 }
   0x2   :  { %12 = vsyncpa [#allocation9], 0  ;;  %s29_s20 = sshll.u32 %s465_s1, 4  ;;  %s30_s20 = int_to_ptr.hbm [resolvable:$true] %s29_s20 }
   0x3   :  { %13 = vsyncpa [#allocation4], 0  ;;  %s407_s21 = smov [#allocation5]   ;;  %s53_s25 = sshll.u32 %s467_s3, 4  ;;  %s54_s25 = int_to_ptr.hbm [resolvable:$true] %s53_s25 }
   0x4   :  { %s31_s22 = sshll.u32 %s407_s21, 4  ;;  %s408_s26 = smov 128   ;;  %s32_s22 = int_to_ptr.vmem [resolvable:$true] %s31_s22 }
   0x5   :  { %s409_s27 = smov 8   ;;  %s410_s28 = smov [#allocation8]  }
   0x6   :  { %37 = dma.hbm_to_vmem [thread:$0]  %s30_s20, 2048, %s32_s22, [#allocation6], %s408_s26, %s408_s26, %s409_s27  }
   0x7   :  { %s55_s29 = sshll.u32 %s410_s28, 4  ;;  %s19_s7 = sshll.u32 %s464_s0, 4  ;;  %s56_s29 = int_to_ptr.vmem [resolvable:$true] %s55_s29  ;;  %s20_s7 = int_to_ptr.hbm [resolvable:$true] %s19_s7 }
   0x8   :  { %61 = dma.hbm_to_vmem [thread:$0]  %s54_s25, 2048, %s56_s29, [#allocation9], %s408_s26, %s408_s26, %s409_s27  }
   0x9   :  { %s43_s9 = sshll.u32 %s466_s2, 4  ;;  %s411_s10 = smov [#allocation2]   ;;  %s44_s9 = int_to_ptr.hbm [resolvable:$true] %s43_s9 }
   0xa   :  { %s21_s11 = sshll.u32 %s411_s10, 4  ;;  %s412_s3 = smov [#allocation7]   ;;  %s22_s11 = int_to_ptr.vmem [resolvable:$true] %s21_s11 }
   0xb   :  { %24 = dma.hbm_to_vmem [thread:$0]  %s20_s7, 128, %s22_s11, [#allocation3]  }
   0xc   :  { %s45_s12 = sshll.u32 %s412_s3, 4  ;;  %s67_s15 = sshll.u32 %s468_s4, 4  ;;  %s46_s12 = int_to_ptr.vmem [resolvable:$true] %s45_s12  ;;  %s68_s15 = int_to_ptr.hbm [resolvable:$true] %s67_s15 }
   0xd   :  { %48 = dma.hbm_to_vmem [thread:$0]  %s44_s9, 128, %s46_s12, [#allocation6]  }
   0xe   :  { %s413_s0 = smov [#allocation10]  }
   0xf   :  { %s69_s16 = sshll.u32 %s413_s0, 4  ;;  %s70_s16 = int_to_ptr.vmem [resolvable:$true] %s69_s16 }
  0x10   :  { %72 = dma.hbm_to_vmem [thread:$0]  %s68_s15, 128, %s70_s16, [#allocation9]  }
  0x11   :  { %399 = dma.done.wait [#allocation3], 128  }
  0x12   :  { %400 = vsyncadd [#allocation3], 4294967168 }
  0x13   :  { %401 = dma.done.wait [#allocation6], 2176  }
  0x14   :  { %402 = vsyncadd [#allocation6], 4294965120 }
  0x15   :  { %403 = dma.done.wait [#allocation9], 2176  }
  0x16   :  { %404 = vsyncadd [#allocation9], 4294965120  ;;  %v113_v0 = vld [vmem:[#allocation5 + $0x70] sm:$0xff]  ;;  %v114_v1 = vld [vmem:[#allocation5 + $0x78] sm:$0xff]  ;;  %v414_v37 = vmov 8.0   ;;  %s415_s2 = smov [#allocation11]  }
  0x17   :  { %v111_v2 = vld [vmem:[#allocation5 + $0x60] sm:$0xff]  ;;  %v122_v3 = vpack.c.bf16 %v114_v1, %v113_v0  ;;  %v112_v4 = vld [vmem:[#allocation5 + $0x68] sm:$0xff]  ;;  %v109_v6 = vld [vmem:[#allocation5 + $0x50] sm:$0xff]  ;;  %251 = vrcp.f32 %v414_v37  ;;  %s226_s4 = sshll.u32 %s415_s2, 4  ;;  %s228_s19 = sshll.u32 %s469_s5, 4  ;;  %s227_s4 = int_to_ptr.vmem [resolvable:$true] %s226_s4  ;;  %s229_s19 = int_to_ptr.hbm [resolvable:$true] %s228_s19 }
  0x18   :  { %v121_v5 = vpack.c.bf16 %v112_v4, %v111_v2  ;;  %v110_v7 = vld [vmem:[#allocation5 + $0x58] sm:$0xff]  ;;  %v107_v9 = vld [vmem:[#allocation5 + $0x40] sm:$0xff]  ;;  %v108_v10 = vld [vmem:[#allocation5 + $0x48] sm:$0xff] }
  0x19   :  { %124 = vmatpush.bf16.msra.mxu0 %v122_v3  ;;  %v120_v8 = vpack.c.bf16 %v110_v7, %v109_v6  ;;  %v119_v11 = vpack.c.bf16 %v108_v10, %v107_v9  ;;  %v105_v12 = vld [vmem:[#allocation5 + $0x30] sm:$0xff]  ;;  %v106_v13 = vld [vmem:[#allocation5 + $0x38] sm:$0xff]  ;;  %v103_v15 = vld [vmem:[#allocation5 + $0x20] sm:$0xff] }
  0x1a   :  { %v118_v14 = vpack.c.bf16 %v106_v13, %v105_v12  ;;  %v104_v16 = vld [vmem:[#allocation5 + $0x28] sm:$0xff]  ;;  %v101_v18 = vld [vmem:[#allocation5 + $0x10] sm:$0xff]  ;;  %v102_v19 = vld [vmem:[#allocation5 + $0x18] sm:$0xff] }
  0x1b   :  { %v117_v17 = vpack.c.bf16 %v104_v16, %v103_v15  ;;  %v116_v20 = vpack.c.bf16 %v102_v19, %v101_v18  ;;  %v99_v21 = vld [vmem:[#allocation5] sm:$0xff]  ;;  %v100_v22 = vld [vmem:[#allocation5 + $0x8] sm:$0xff]  ;;  %v97_v24 = vld [vmem:[#allocation2] sm:$0xff] }
  0x1c   :  { %v115_v23 = vpack.c.bf16 %v100_v22, %v99_v21  ;;  %v98_v25 = vpack.c.bf16 %v97_v24, %v97_v24  ;;  %v196_v26 = vld [vmem:[#allocation8 + $0x70] sm:$0xff]  ;;  %v197_v27 = vld [vmem:[#allocation8 + $0x78] sm:$0xff]  ;;  %v194_v28 = vld [vmem:[#allocation8 + $0x60] sm:$0xff] }
  0x1d   :  { %125 = vmatpush.bf16.msra.mxu0 %v121_v5  ;;  %v205_v29 = vpack.c.bf16 %v197_v27, %v196_v26  ;;  %v195_v30 = vld [vmem:[#allocation8 + $0x68] sm:$0xff]  ;;  %v192_v32 = vld [vmem:[#allocation8 + $0x50] sm:$0xff]  ;;  %v193_v33 = vld [vmem:[#allocation8 + $0x58] sm:$0xff]  ;;  %v252_v41 = vpop.eup %251 }
  0x1e   :  { %v204_v31 = vpack.c.bf16 %v195_v30, %v194_v28  ;;  %v203_v34 = vpack.c.bf16 %v193_v33, %v192_v32  ;;  %v190_v35 = vld [vmem:[#allocation8 + $0x40] sm:$0xff]  ;;  %v191_v36 = vld [vmem:[#allocation8 + $0x48] sm:$0xff]  ;;  %v188_v39 = vld [vmem:[#allocation8 + $0x30] sm:$0xff]  ;;  %v145_v46 = vmul.f32 8.0, %v252_v41  ;;  %vm149_vm0 = vweird.f32 %v252_v41 }
  0x1f   :  { %207 = vmatpush.bf16.msra.mxu1 %v205_v29  ;;  %v202_v38 = vpack.c.bf16 %v191_v36, %v190_v35  ;;  %v189_v40 = vld [vmem:[#allocation8 + $0x38] sm:$0xff]  ;;  %v186_v44 = vld [vmem:[#allocation8 + $0x20] sm:$0xff]  ;;  %v187_v45 = vld [vmem:[#allocation8 + $0x28] sm:$0xff] }
  0x20   :  { %v201_v42 = vpack.c.bf16 %v189_v40, %v188_v39  ;;  %v249_v43 = vld [vmem:[#allocation7] ss:$0 sm:$0xff]  ;;  %v200_v48 = vpack.c.bf16 %v187_v45, %v186_v44  ;;  %v184_v50 = vld [vmem:[#allocation8 + $0x10] sm:$0xff]  ;;  %v146_v52 = vsub.f32 1.0, %v145_v46  ;;  %v182_v57 = vld [vmem:[#allocation8] sm:$0xff] }
  0x21   :  { %126 = vmatpush.bf16.msra.mxu0 %v120_v8  ;;  %v185_v51 = vld [vmem:[#allocation8 + $0x18] sm:$0xff]  ;;  %v183_v58 = vld [vmem:[#allocation8 + $0x8] sm:$0xff] }
  0x22   :  { %v199_v54 = vpack.c.bf16 %v185_v51, %v184_v50  ;;  %v147_v59 = vmul.f32 %v252_v41, %v146_v52  ;;  %v198_v63 = vpack.c.bf16 %v183_v58, %v182_v57  ;;  %v94_v22 = vld [vmem:[#allocation7 + $0x1] sm:$0x1]  ;;  %v95_v26 = vld [vmem:[#allocation7 + $0x2] sm:$0x1] }
  0x23   :  { %208 = vmatpush.bf16.msra.mxu1 %v204_v31 }
  0x24   :  { %v148_v2 = vadd.f32 %v252_v41, %v147_v59 }
  0x25   :  { %127 = vmatpush.bf16.msra.mxu0 %v119_v11 }
  0x26   :  { %v150_v7 = vsel %vm149_vm0, %v252_v41, %v148_v2 }
  0x27   :  { %209 = vmatpush.bf16.msra.mxu1 %v203_v34  ;;  %v250_v34 = vld [vmem:[#allocation7 + $0x3] ss:$0 sm:$0xff] }
  0x29   :  { %128 = vmatpush.bf16.msra.mxu0 %v118_v14 }
  0x2b   :  { %210 = vmatpush.bf16.msra.mxu1 %v202_v38 }
  0x2d   :  { %129 = vmatpush.bf16.msra.mxu0 %v117_v17 }
  0x2f   :  { %211 = vmatpush.bf16.msra.mxu1 %v201_v42 }
  0x31   :  { %130 = vmatpush.bf16.msra.mxu0 %v116_v20 }
  0x33   :  { %212 = vmatpush.bf16.msra.mxu1 %v200_v48 }
  0x35   :  { %131 = vmatpush.bf16.msra.mxu0 %v115_v23 }
  0x37   :  { %213 = vmatpush.bf16.msra.mxu1 %v199_v54 }
  0x38   :  { %132 = vmatmul.bf16.vlgmr.msra.gmra.mxu0 %v98_v25 }
  0x3b   :  { %214 = vmatpush.bf16.msra.mxu1 %v198_v63 }
  0xb5   :  { %v133_v47 = vpop.f32.mrf.mxu0 }
  0xb6   :  { %v134_v49 = vadd.f32 %v249_v43, %v133_v47 }
  0xb8   :  { %v137_v53 = vmax.f32 %v134_v49, 0.0 }
  0xba   :  { %v138_v55 = vrot.slane %v137_v53, 4  ;;  %v152_v56 = vmul.f32 %v137_v53, %v137_v53 }
  0xbc   :  { %v139_v60 = vadd.f32 %v138_v55, %v137_v53  ;;  %v153_v61 = vrot.slane %v152_v56, 4 }
  0xbd   :  { %v135_v62 = vpop.f32.mrf.mxu0 }
  0xbe   :  { %v140_v0 = vrot.slane %v139_v60, 2  ;;  %v154_v1 = vadd.f32 %v153_v61, %v152_v56 }
  0xc0   :  { %v141_v3 = vadd.f32 %v140_v0, %v139_v60  ;;  %v155_v4 = vrot.slane %v154_v1, 2 }
  0xc2   :  { %v156_v5 = vadd.f32 %v155_v4, %v154_v1  ;;  %v142_v6 = vrot.slane %v141_v3, 1 }
  0xc4   :  { %v143_v8 = vadd.f32 %v142_v6, %v141_v3  ;;  %v157_v9 = vrot.slane %v156_v5, 1 }
  0xc6   :  { %v151_v10 = vmul.f32 %v150_v7, %v143_v8  ;;  %v158_v11 = vadd.f32 %v157_v9, %v156_v5 }
  0xc8   :  { %v159_v12 = vmul.f32 %v158_v11, %v150_v7  ;;  %v160_v13 = vmul.f32 %v151_v10, %v151_v10 }
  0xca   :  { %v161_v14 = vsub.f32 %v159_v12, %v160_v13 }
  0xcc   :  { %v162_v15 = vmax.f32 %v161_v14, 0.0 }
  0xce   :  { %v163_v16 = vadd.f32 1e-05, %v162_v15 }
  0xd0   :  { %253 = vrsqrt.f32 %v163_v16  ;;  %vm170_vm2 = vweird.f32 %v163_v16 }
  0xd6   :  { %v254_v17 = vpop.eup %253 }
  0xd7   :  { %v165_v18 = vmul.f32 %v254_v17, %v163_v16  ;;  %vm171_vm1 = vweird.f32 %v254_v17 }
  0xd8   :  { %vm172_vm3 = vmor %vm170_vm2, %vm171_vm1 }
  0xd9   :  { %v166_v19 = vmul.f32 %v254_v17, %v165_v18 }
  0xdb   :  { %v167_v20 = vmul.f32 0.5, %v166_v19 }
  0xdd   :  { %v168_v21 = vsub.f32 1.5, %v167_v20 }
  0xdf   :  { %v169_v23 = vmul.f32 %v254_v17, %v168_v21 }
  0xe1   :  { %v173_v24 = vsel %vm172_vm3, %v254_v17, %v169_v23 }
  0xe2   :  { %v174_v25 = vmul.f32 %v173_v24, %v94_v22 }
  0xe4   :  { %v175_v27 = vmul.f32 %v174_v25, %v151_v10  ;;  %v177_v28 = vperm.slane %v174_v25, 0 }
  0xe6   :  { %v176_v29 = vsub.f32 %v95_v26, %v175_v27  ;;  %v178_v30 = vmul.f32 %v177_v28, %v137_v53 }
  0xe8   :  { %v179_v31 = vperm.slane %v176_v29, 0 }
  0xea   :  { %v180_v32 = vadd.f32 %v179_v31, %v178_v30 }
  0xec   :  { %v181_v33 = vpack.c.bf16 %v180_v32, %v180_v32 }
  0xee   :  { %215 = vmatmul.bf16.vlgmr.msra.gmra.mxu1 %v181_v33 }
 0x16b   :  { %v216_v35 = vpop.f32.mrf.mxu1 }
 0x16c   :  { %v217_v36 = vadd.f32 %v250_v34, %v216_v35 }
 0x16e   :  { %220 = vst [vmem:[#allocation11] sm:$0xff] %v217_v36 }
 0x16f   :  { %231 = dma.vmem_to_hbm [thread:$0]  %s227_s4, 128, %s229_s19, [#allocation4]  }
 0x173   :  { %v218_v37 = vpop.f32.mrf.mxu1 }
 0x174   :  { %405 = dma.done.wait [#allocation4], 128  }
 0x175   :  { %406 = vsyncadd [#allocation4], 4294967168 }
 0x176   :  { %236 = vsyncpa [#allocation3], 1 }
 0x177   :  { %237 = vsyncpa [#allocation6], 1 }
 0x178   :  { %238 = vsyncpa [#allocation9], 1 }
 0x179   :  { %239 = vsyncpa [#allocation4], 1 }

</bundles_post_ra>
